<compile_context>
chip_gen: v7x
topology: tpu7x:2x2x1
jax: 0.10.0
libtpu: 0.0.40
codegen_flags: <defaults>
</compile_context>

<pallas_src>
import math
import functools

import jax
import jax.numpy as jnp
from jax import lax
from jax.experimental import pallas as pl
from jax.experimental.pallas import tpu as pltpu

_LN_EPS = 1e-6        # UER / K-BERT LayerNorm eps


# --------------------- per-generation VMEM budget / tiling -------------------

def _vmem_limit_bytes():
    cap = 64 * 1024 * 1024
    try:
        cap = int(getattr(pltpu.get_tpu_info(), "vmem_capacity_bytes", cap))
    except Exception:
        pass
    if cap >= 100 * 1024 * 1024:                       # v5e / v6e: 128 MiB physical
        return 100 * 1024 * 1024
    # v7x-class parts (64 MiB): leave headroom for compiler/internal scratch.
    return max(32 * 1024 * 1024, min(cap - 12 * 1024 * 1024, 48 * 1024 * 1024))


_VMEM_LIMIT = _vmem_limit_bytes()
_ROW_CAP = 512 if _VMEM_LIMIT >= 96 * 1024 * 1024 else 256
_SEQ_CAP = 512 if _VMEM_LIMIT >= 96 * 1024 * 1024 else 256


def _row_tile(n):
    return n if n <= _ROW_CAP else _ROW_CAP


def _seq_tile(s):
    return s if (s <= _SEQ_CAP or s % _SEQ_CAP != 0) else _SEQ_CAP


@functools.lru_cache(maxsize=None)
def _buffered1_supported():
    """Probe whether pipeline_mode=pl.Buffered(1) lowers on this JAX/TPU build."""
    try:
        spec = pl.BlockSpec((8, 128), lambda i: (0, 0), pipeline_mode=pl.Buffered(1))

        def k(a_ref, o_ref):
            o_ref[...] = a_ref[...] + 1.0

        out = pl.pallas_call(
            k, out_shape=jax.ShapeDtypeStruct((8, 128), jnp.float32),
            grid=(2,), in_specs=[spec],
            out_specs=pl.BlockSpec((8, 128), lambda i: (0, 0)),
        )(jnp.zeros((8, 128), jnp.float32))
        jax.block_until_ready(out)
        return True
    except Exception:
        return False


def _const_spec(shape):
    """Grid-invariant (weight) block; single-buffered when supported (saves VMEM)."""
    imap = lambda *_: (0,) * len(shape)
    if _buffered1_supported():
        return pl.BlockSpec(shape, imap, pipeline_mode=pl.Buffered(1))
    return pl.BlockSpec(shape, imap)


# ----------------------------- LayerNorm kernel -----------------------------

def _layernorm_kernel(x_ref, g_ref, b_ref, o_ref, *, eps):
    x = x_ref[...]                                            # (TR, H)
    mu = jnp.mean(x, axis=-1, keepdims=True)
    var = jnp.mean((x - mu) ** 2, axis=-1, keepdims=True)
    o_ref[...] = (x - mu) * lax.rsqrt(var + eps) * g_ref[...] + b_ref[...]


def layernorm(x, gamma, beta, eps=_LN_EPS):
    # x: (B, S, H); gamma/beta: (1, H).  Row-tiled over B*S, parallel grid.
    B, S, H = x.shape
    R = B * S
    TR = _row_tile(R)
    out = pl.pallas_call(
        functools.partial(_layernorm_kernel, eps=eps),
        out_shape=jax.ShapeDtypeStruct((R, H), x.dtype),
        grid=(pl.cdiv(R, TR),),
        in_specs=[pl.BlockSpec((TR, H), lambda i: (i, 0)),
                  _const_spec((1, H)),
                  _const_spec((1, H))],
        out_specs=pl.BlockSpec((TR, H), lambda i: (i, 0)),
        compiler_params=pltpu.CompilerParams(
            dimension_semantics=("parallel",),
            vmem_limit_bytes=_VMEM_LIMIT),
    )(x.reshape(R, H), gamma, beta)
    return out.reshape(B, S, H)


# ----------------------- Transformer encoder layer kernel --------------------

def encoder_layer(x, vis, p, num_heads):
    """One post-LN transformer encoder layer.

    x:   (B, S, H) bf16 activations
    vis: (B, 1, S) key visibility (1 = attend), or (B, S, S) K-BERT visible
         matrix, in bf16.
    """
    B, S, H = x.shape
    FF = p["w1"].shape[1]
    R = vis.shape[1]                        # 1 (key mask) or S (visible matrix)
    assert H % num_heads == 0
    dh = H // num_heads
    TQ = _seq_tile(S)
    NQ = S // TQ
    cdt = p["wqkv"].dtype                   # bf16 compute dtype for MXU inputs

    wo_hm = p["wo"].reshape(num_heads, dh, H)   # head-major Wo row blocks

    def _gelu(v):                           # tanh-approx GELU
        return 0.5 * v * (1.0 + jnp.tanh(0.7978845608028654 *
                                         (v + 0.044715 * v * v * v)))

    def _ln(v, g, b):
        mu = jnp.mean(v, axis=-1, keepdims=True)
        var = jnp.mean((v - mu) ** 2, axis=-1, keepdims=True)
        return (v - mu) * lax.rsqrt(var + _LN_EPS) * g + b

    def kernel(x_ref, vis_ref, wqkv_ref, bqkv_ref, wo_ref, bo_ref,
               w1_ref, b1_ref, w2_ref, b2_ref, ln1_ref, ln2_ref,
               o_ref, q_s, k_s, v_s):
        qi = pl.program_id(1)

        # Fused QKV projection once per batch element; head-major bf16 scratch
        # stays resident in VMEM across the query-tile axis.
        @pl.when(qi == 0)
        def _():
            xs = x_ref[0]                                          # (S, H) bf16
            qkv = jnp.dot(xs, wqkv_ref[...],
                          preferred_element_type=jnp.float32) + bqkv_ref[...]
            for h in range(num_heads):                             # static fill
                q_s[h] = qkv[:, h * dh:(h + 1) * dh].astype(cdt)
                k_s[h] = qkv[:, H + h * dh:H + (h + 1) * dh].astype(cdt)
                v_s[h] = qkv[:, 2 * H + h * dh:2 * H + (h + 1) * dh].astype(cdt)

        r0 = pl.multiple_of(qi * TQ, TQ)
        xq = x_ref[0, pl.ds(r0, TQ), :].astype(jnp.float32)        # residual

        # Additive attention bias rebuilt in-kernel from the tiny bf16 mask.
        vis_q = vis_ref[0].astype(jnp.float32)                     # (1,S) or (TQ,S)
        bias = (1.0 - vis_q) * -10000.0

        # Multi-head attention; 1/sqrt(dh) is folded into Wq, all MXU operands
        # are bf16, per-head context feeds the head-major Wo block directly.
        def head_body(h, acc):
            qh = q_s[h, pl.ds(r0, TQ), :]                          # (TQ, dh) bf16
            kh = k_s[h]                                            # (S, dh)  bf16
            vh = v_s[h]                                            # (S, dh)  bf16
            s = lax.dot_general(qh, kh, (((1,), (1,)), ((), ())),
                                preferred_element_type=jnp.float32) + bias
            s = s - jnp.max(s, axis=-1, keepdims=True)
            e = jnp.exp(s)
            probs = (e * pl.reciprocal(jnp.sum(e, axis=-1, keepdims=True),
                                       approx=True)).astype(cdt)
            ctx = jnp.dot(probs, vh,
                          preferred_element_type=jnp.float32).astype(cdt)
            return acc + jnp.dot(ctx, wo_ref[h],
                                 preferred_element_type=jnp.float32)

        attn = lax.fori_loop(0, num_heads, head_body,
                             jnp.zeros((TQ, H), jnp.float32)) + bo_ref[...]

        h1 = _ln(attn + xq, ln1_ref[0], ln1_ref[1])                # residual 1
        f = _gelu(jnp.dot(h1.astype(cdt), w1_ref[...],
                          preferred_element_type=jnp.float32) + b1_ref[...])
        f = jnp.dot(f.astype(cdt), w2_ref[...],
                    preferred_element_type=jnp.float32) + b2_ref[...]
        o_ref[0] = _ln(f + h1, ln2_ref[0], ln2_ref[1]).astype(o_ref.dtype)

    vis_spec = (pl.BlockSpec((1, 1, S), lambda b, q: (b, 0, 0)) if R == 1
                else pl.BlockSpec((1, TQ, S), lambda b, q: (b, q, 0)))

    return pl.pallas_call(
        kernel,
        out_shape=jax.ShapeDtypeStruct((B, S, H), x.dtype),
        grid=(B, NQ),
        in_specs=[
            pl.BlockSpec((1, S, H), lambda b, q: (b, 0, 0)),       # x (full seq)
            vis_spec,                                              # mask / vm (bf16)
            _const_spec((H, 3 * H)),                               # fused Wqkv bf16
            _const_spec((1, 3 * H)),                               # fused bqkv
            _const_spec((num_heads, dh, H)),                       # head-major Wo bf16
            _const_spec((1, H)),                                   # bo
            _const_spec((H, FF)),                                  # W1 bf16
            _const_spec((1, FF)),                                  # b1
            _const_spec((FF, H)),                                  # W2 bf16
            _const_spec((1, H)),                                   # b2
            _const_spec((2, 1, H)),                                # LN1 gamma/beta
            _const_spec((2, 1, H)),                                # LN2 gamma/beta
        ],
        out_specs=pl.BlockSpec((1, TQ, H), lambda b, q: (b, q, 0)),
        scratch_shapes=[pltpu.VMEM((num_heads, S, dh), cdt),       # Q (head-major)
                        pltpu.VMEM((num_heads, S, dh), cdt),       # K
                        pltpu.VMEM((num_heads, S, dh), cdt)],      # V
        compiler_params=pltpu.CompilerParams(
            dimension_semantics=("parallel", "arbitrary"),
            vmem_limit_bytes=_VMEM_LIMIT),
    )(x, vis, p["wqkv"], p["bqkv"], wo_hm, p["bo"], p["w1"], p["b1"],
      p["w2"], p["b2"], p["ln1"], p["ln2"])


# --------------- Output layer + log-softmax + masked NLL loss kernel ---------

def _out_loss_kernel(x_ref, w_ref, b_ref, lab_ref, stats_ref, pred_ref):
    logits = jnp.dot(x_ref[...].astype(w_ref.dtype), w_ref[...],
                     preferred_element_type=jnp.float32) + b_ref[...]
    # log-softmax over 128-padded label lanes; padded lanes carry a -1e9 bias.
    m = jnp.max(logits, axis=-1, keepdims=True)
    z = logits - m
    lse = jnp.log(jnp.sum(jnp.exp(z), axis=-1, keepdims=True))
    lp = z - lse                                                   # (TN, Lp)

    lab = lab_ref[...]                                             # (TN, 1) int32
    lmask = (lab > 0).astype(jnp.float32)                          # label==0 is pad

    iota = lax.broadcasted_iota(jnp.int32, lp.shape, 1)
    onehot = (iota == lab).astype(jnp.float32)                     # scatter_(1,label,1)
    nll = -jnp.sum(lp * onehot, axis=-1, keepdims=True) * lmask    # (TN, 1)

    maxv = jnp.max(lp, axis=-1, keepdims=True)
    pred = jnp.min(jnp.where(lp == maxv, iota, lp.shape[-1]),      # first argmax
                   axis=-1, keepdims=True).astype(jnp.int32)
    pred_ref[...] = pred
    hit = (pred == lab).astype(jnp.float32) * lmask

    num = jnp.sum(nll)
    den = jnp.sum(lmask)
    corr = jnp.sum(hit)
    # Lane-dense per-tile partial sums (parallel grid, no accumulator carry):
    lane = lax.broadcasted_iota(jnp.int32, (8, 128), 1)
    sub = lax.broadcasted_iota(jnp.int32, (8, 128), 0)
    r0 = sub == 0
    stats_ref[...] = jnp.where(r0 & (lane == 0), num,
                      jnp.where(r0 & (lane == 1), den,
                       jnp.where(r0 & (lane == 2), corr, 0.0)))


def output_and_loss(x, w_pad, b_pad, label):
    # x: (N, H) bf16; w_pad: (H, Lp) bf16; b_pad: (1, Lp) f32 (-1e9 on pad lanes)
    N, H = x.shape
    Lp = w_pad.shape[1]
    TN = _row_tile(N)
    nt = pl.cdiv(N, TN)
    npad = nt * TN
    if npad != N:                         # pad rows -> label 0 -> ignored in loss
        x = jnp.pad(x, ((0, npad - N), (0, 0)))
        label = jnp.pad(label, ((0, npad - N), (0, 0)))

    stats, pred = pl.pallas_call(
        _out_loss_kernel,
        out_shape=(jax.ShapeDtypeStruct((nt * 8, 128), jnp.float32),
                   jax.ShapeDtypeStruct((npad, 1), jnp.int32)),
        grid=(nt,),
        in_specs=[pl.BlockSpec((TN, H), lambda i: (i, 0)),
                  _const_spec((H, Lp)),
                  _const_spec((1, Lp)),
                  pl.BlockSpec((TN, 1), lambda i: (i, 0))],
        out_specs=(pl.BlockSpec((8, 128), lambda i: (i, 0)),
                   pl.BlockSpec((TN, 1), lambda i: (i, 0))),
        compiler_params=pltpu.CompilerParams(
            dimension_semantics=("parallel",),
            vmem_limit_bytes=_VMEM_LIMIT),
    )(x, w_pad, b_pad, label)

    num = jnp.sum(stats[:, 0])
    den = jnp.sum(stats[:, 1])
    corr = jnp.sum(stats[:, 2])
    loss = num / (den + 1e-6)
    return loss, corr, pred[:N, 0]


# ------------------------------ Parameter setup ------------------------------

def init_params(key, *, vocab, max_pos, seg_types, hidden, ff, layers, labels, heads):
    ks = iter(jax.random.split(key, 4 + 4 * layers))

    def nrm(shape):
        return jax.random.normal(next(ks), shape, jnp.float32) * 0.02

    dh = hidden // heads
    scale = 1.0 / math.sqrt(dh)

    lp = max(128, ((labels + 127) // 128) * 128)        # pad labels to 128 lanes
    out_w = jnp.zeros((hidden, lp), jnp.float32).at[:, :labels].set(
        nrm((hidden, labels)))
    out_b = jnp.full((1, lp), -1e9, jnp.float32).at[:, :labels].set(0.0)

    params = {
        "word_emb": nrm((vocab, hidden)),
        "pos_emb": nrm((max_pos, hidden)),
        "seg_emb": nrm((seg_types, hidden)),
        "emb_ln_g": jnp.ones((1, hidden), jnp.float32),
        "emb_ln_b": jnp.zeros((1, hidden), jnp.float32),
        "out_w": out_w.astype(jnp.bfloat16),            # bf16 weights, f32 accum
        "out_b": out_b,
        "labels_num": labels,
        "layers": [],
    }
    ln_init = jnp.stack([jnp.ones((1, hidden), jnp.float32),
                         jnp.zeros((1, hidden), jnp.float32)])       # (2, 1, H)
    for _ in range(layers):
        wqkv = nrm((hidden, 3 * hidden))
        wqkv = wqkv.at[:, :hidden].multiply(scale)       # fold 1/sqrt(dh) into Wq
        bqkv = jnp.zeros((1, 3 * hidden), jnp.float32)   # (bq is pre-scaled too)
        params["layers"].append({
            "wqkv": wqkv.astype(jnp.bfloat16),           # fused Q|K|V
            "bqkv": bqkv,
            "wo": nrm((hidden, hidden)).astype(jnp.bfloat16),
            "bo": jnp.zeros((1, hidden), jnp.float32),
            "w1": nrm((hidden, ff)).astype(jnp.bfloat16),
            "b1": jnp.zeros((1, ff), jnp.float32),
            "w2": nrm((ff, hidden)).astype(jnp.bfloat16),
            "b2": jnp.zeros((1, hidden), jnp.float32),
            "ln1": ln_init,
            "ln2": ln_init,
        })
    return params


# --------------------------------- Forward ----------------------------------

def bert_tagger_forward(params, src, label, mask, pos=None, vm=None, *, num_heads):
    B, S = src.shape
    if pos is None:
        pos = jnp.broadcast_to(jnp.arange(S, dtype=jnp.int32)[None, :], (B, S))

    # BERT embedding: word + position + segment, then LayerNorm (Pallas kernel).
    emb = (params["word_emb"][src]
           + params["pos_emb"][pos]
           + params["seg_emb"][mask])
    emb = layernorm(emb, params["emb_ln_g"], params["emb_ln_b"])

    # Key visibility (1 = attend): small (B,1,S) mask, or K-BERT visible matrix.
    if vm is None:
        vis = (mask > 0).astype(jnp.bfloat16).reshape(B, 1, S)
    else:
        vis = vm.astype(jnp.bfloat16).reshape(B, S, S)

    h = emb.astype(jnp.bfloat16)            # bf16 inter-layer activations
    for lyr in params["layers"]:
        h = encoder_layer(h, vis, lyr, num_heads)

    x2 = h.reshape(B * S, -1)
    lab2 = label.reshape(B * S, 1).astype(jnp.int32)
    loss, correct, predict = output_and_loss(
        x2, params["out_w"], params["out_b"], lab2)
    return loss, correct, predict, label.reshape(-1)


# ----------------------------------- Main ------------------------------------

if __name__ == "__main__":
    B, S, H, FF, HEADS, LAYERS = 2, 8, 32, 64, 2, 2
    VOCAB, LABELS, SEG_TYPES, MAX_POS = 64, 8, 3, 64

    key = jax.random.PRNGKey(0)
    kp, ksrc, klab = jax.random.split(key, 3)
    params = init_params(kp, vocab=VOCAB, max_pos=MAX_POS, seg_types=SEG_TYPES,
                         hidden=H, ff=FF, layers=LAYERS, labels=LABELS, heads=HEADS)

    src = jax.random.randint(ksrc, (B, S), 1, VOCAB, dtype=jnp.int32)
    label = jax.random.randint(klab, (B, S), 1, LABELS, dtype=jnp.int32)
    lengths = jnp.array([S, S - 2], dtype=jnp.int32)
    mask = (jnp.arange(S)[None, :] < lengths[:, None]).astype(jnp.int32)  # (B, S)
    src = src * mask
    label = label * mask            # padding positions -> label 0 (masked in loss)

    loss, correct, predict, gold = bert_tagger_forward(
        params, src, label, mask, pos=None, vm=None, num_heads=HEADS)
    jax.block_until_ready((loss, correct, predict, gold))
    print("KERNEL_OK")
</pallas_src>

<mosaic_0001>
module attributes {stable_mosaic.version = 11 : i64} {
  func.func @k(%arg0: i32, %arg1: memref<8x128xf32, #tpu.memory_space<vmem>>, %arg2: memref<8x128xf32, #tpu.memory_space<vmem>>) attributes {dimension_semantics = [#tpu.dimension_semantics<arbitrary>], iteration_bounds = array<i64: 2>, scalar_prefetch = 0 : i64, scratch_operands = 0 : i64, tpu.core_type = #tpu.core_type<tc>, window_params = [{pipeline_mode = #tpu.pipeline_mode<synchronous>, transform_indices = @transform_0, window_bounds = array<i64: 8, 128>}, {pipeline_mode = #tpu.pipeline_mode<synchronous>, transform_indices = @transform_1, window_bounds = array<i64: 8, 128>}]} {
    %c0 = arith.constant 0 : index
    %c0_0 = arith.constant 0 : index
    %0 = vector.load %arg1[%c0, %c0_0] : memref<8x128xf32, #tpu.memory_space<vmem>>, vector<8x128xf32>
    %cst = arith.constant 1.000000e+00 : f32
    %1 = vector.broadcast %cst : f32 to vector<8x128xf32>
    %2 = arith.addf %0, %1 : vector<8x128xf32>
    %c0_1 = arith.constant 0 : index
    %c0_2 = arith.constant 0 : index
    %3 = vector.load %arg2[%c0_1, %c0_2] : memref<8x128xf32, #tpu.memory_space<vmem>>, vector<8x128xf32>
    tpu.vector_store %arg2[%c0_1, %c0_2], %2 {strides = array<i32>} : memref<8x128xf32, #tpu.memory_space<vmem>>, vector<8x128xf32>,
    return
  }
  func.func @transform_0(%arg0: i32) -> (i32, i32) {
    %c0_i32 = arith.constant 0 : i32
    %c0_i32_0 = arith.constant 0 : i32
    %c0_i32_1 = arith.constant 0 : i32
    return %c0_i32, %c0_i32_0 : i32, i32
  }
  func.func @transform_1(%arg0: i32) -> (i32, i32) {
    %c0_i32 = arith.constant 0 : i32
    %c0_i32_0 = arith.constant 0 : i32
    %c0_i32_1 = arith.constant 0 : i32
    return %c0_i32, %c0_i32_0 : i32, i32
  }
}

module attributes {stable_mosaic.version = 11 : i64} {
  func.func @_layernorm_kernel(%arg0: i32, %arg1: memref<16x32xf32, #tpu.memory_space<vmem>>, %arg2: memref<1x32xf32, #tpu.memory_space<vmem>>, %arg3: memref<1x32xf32, #tpu.memory_space<vmem>>, %arg4: memref<16x32xf32, #tpu.memory_space<vmem>>) attributes {dimension_semantics = [#tpu.dimension_semantics<parallel>], iteration_bounds = array<i64: 1>, scalar_prefetch = 0 : i64, scratch_operands = 0 : i64, tpu.core_type = #tpu.core_type<tc>, window_params = [{transform_indices = @transform_0, window_bounds = array<i64: 16, 32>}, {pipeline_mode = #tpu.pipeline_mode<synchronous>, transform_indices = @transform_1, window_bounds = array<i64: 1, 32>}, {pipeline_mode = #tpu.pipeline_mode<synchronous>, transform_indices = @transform_2, window_bounds = array<i64: 1, 32>}, {transform_indices = @transform_3, window_bounds = array<i64: 16, 32>}]} {
    %c0 = arith.constant 0 : index
    %c0_0 = arith.constant 0 : index
    %0 = vector.load %arg1[%c0, %c0_0] : memref<16x32xf32, #tpu.memory_space<vmem>>, vector<16x32xf32>
    %cst = arith.constant dense<0.000000e+00> : vector<16xf32>
    %1 = vector.multi_reduction <add>, %0, %cst [1] : vector<16x32xf32> to vector<16xf32>
    %2 = vector.shape_cast %1 : vector<16xf32> to vector<16x1xf32>
    %cst_1 = arith.constant 3.200000e+01 : f32
    %3 = vector.broadcast %cst_1 : f32 to vector<16x1xf32>
    %4 = arith.divf %2, %3 : vector<16x1xf32>
    %5 = vector.broadcast %4 : vector<16x1xf32> to vector<16x32xf32>
    %6 = arith.subf %0, %5 : vector<16x32xf32>
    %7 = arith.mulf %6, %6 : vector<16x32xf32>
    %cst_2 = arith.constant dense<0.000000e+00> : vector<16xf32>
    %8 = vector.multi_reduction <add>, %7, %cst_2 [1] : vector<16x32xf32> to vector<16xf32>
    %9 = vector.shape_cast %8 : vector<16xf32> to vector<16x1xf32>
    %cst_3 = arith.constant 3.200000e+01 : f32
    %10 = vector.broadcast %cst_3 : f32 to vector<16x1xf32>
    %11 = arith.divf %9, %10 : vector<16x1xf32>
    %12 = vector.broadcast %4 : vector<16x1xf32> to vector<16x32xf32>
    %13 = arith.subf %0, %12 : vector<16x32xf32>
    %cst_4 = arith.constant 9.99999997E-7 : f32
    %14 = vector.broadcast %cst_4 : f32 to vector<16x1xf32>
    %15 = arith.addf %11, %14 : vector<16x1xf32>
    %16 = math.rsqrt %15 : vector<16x1xf32>
    %17 = vector.broadcast %16 : vector<16x1xf32> to vector<16x32xf32>
    %18 = arith.mulf %13, %17 : vector<16x32xf32>
    %c0_5 = arith.constant 0 : index
    %c0_6 = arith.constant 0 : index
    %19 = vector.load %arg2[%c0_5, %c0_6] : memref<1x32xf32, #tpu.memory_space<vmem>>, vector<1x32xf32>
    %20 = vector.broadcast %19 : vector<1x32xf32> to vector<16x32xf32>
    %21 = arith.mulf %18, %20 : vector<16x32xf32>
    %c0_7 = arith.constant 0 : index
    %c0_8 = arith.constant 0 : index
    %22 = vector.load %arg3[%c0_7, %c0_8] : memref<1x32xf32, #tpu.memory_space<vmem>>, vector<1x32xf32>
    %23 = vector.broadcast %22 : vector<1x32xf32> to vector<16x32xf32>
    %24 = arith.addf %21, %23 : vector<16x32xf32>
    %c0_9 = arith.constant 0 : index
    %c0_10 = arith.constant 0 : index
    %25 = vector.load %arg4[%c0_9, %c0_10] : memref<16x32xf32, #tpu.memory_space<vmem>>, vector<16x32xf32>
    tpu.vector_store %arg4[%c0_9, %c0_10], %24 {strides = array<i32>} : memref<16x32xf32, #tpu.memory_space<vmem>>, vector<16x32xf32>,
    return
  }
  func.func @transform_0(%arg0: i32) -> (i32, i32) {
    %c0_i32 = arith.constant 0 : i32
    %c0_i32_0 = arith.constant 0 : i32
    return %arg0, %c0_i32 : i32, i32
  }
  func.func @transform_1(%arg0: i32) -> (i32, i32) {
    %c0_i32 = arith.constant 0 : i32
    %c0_i32_0 = arith.constant 0 : i32
    %c0_i32_1 = arith.constant 0 : i32
    return %c0_i32, %c0_i32_0 : i32, i32
  }
  func.func @transform_2(%arg0: i32) -> (i32, i32) {
    %c0_i32 = arith.constant 0 : i32
    %c0_i32_0 = arith.constant 0 : i32
    %c0_i32_1 = arith.constant 0 : i32
    return %c0_i32, %c0_i32_0 : i32, i32
  }
  func.func @transform_3(%arg0: i32) -> (i32, i32) {
    %c0_i32 = arith.constant 0 : i32
    %c0_i32_0 = arith.constant 0 : i32
    return %arg0, %c0_i32 : i32, i32
  }
}

</mosaic_0001>

<bundles_post_ra>
// kernel: tpu_custom_call.1
= control target key start
LH: loop header
LB: loop body
LE: loop exit
PB: predicated region body
PF: predicated region fallthrough
CT: control target
= control target key end

     0   :  { %6 = vsyncpa [#allocation3], 0  ;;  %s341_s0 = inlined_call_operand.hbm [shape: f32[8,128], index: 0, kind: input, shape index: {}]   ;;  %s342_s1 = inlined_call_operand.hbm [shape: f32[8,128], index: 1, kind: output, shape index: {}]  }
   0x1   :  { %7 = vsyncpa [#allocation4], 0  ;;  %s262_s6 = smov 0  }
   0x2 LB: > { %s145_s7 = sadd.s32 4294967295, %s248_s6   ;;  %p146_p0 = scmp.ge.s32.totalorder %s248_s6, 1  ;;  %s248_s6 = sphi %s262_s6, %s13_s6  }
   0x3   : > { %p60_p1 = scmp.lt.s32.totalorder %s248_s6, 3  ;;  %p276_p3 = scmp.eq.s32.totalorder %s145_s7, 0 }
   0x4   : > { %s250_s10 = smov [#allocation2]   ;;  %s180_s15 = scalar_lea.hbm %s341_s0, 128 }
   0x5   : > { %p270_p2 = pnand %p146_p0, %p60_p1  ;;  %s73_s11 = sshll.u32 %s250_s10, 4  ;;  %s74_s11 = int_to_ptr.vmem [resolvable:$true] %s73_s11 }
   0x6   : > { %s347_s9 = scalar_select %p276_p3, 1, 0 }
   0x7   : > { %s346_s8 = scalar_select %p270_p2, 1, 0 }
   0x8   : > { %p162_p4 = pneg %p270_p2  ;;  %p181_p6 = scmp.ne.s32.totalorder %s341_s0, %s180_s15 }
   0x9   : > { %p187_p10 = scmp.lt.u32.totalorder %s180_s15, %s341_s0 }
   0xa   : > { %p284_p5 = pnand %p276_p3, %p162_p4 }
   0xc   : > { %p182_p7 = pneg %p284_p5 }
   0xe   : > { %p183_p8 = pnand %p182_p7, %p181_p6 }
  0x10   : > { %p184_p9 = pneg %p183_p8 }
  0x12   : > { %p189_p11 = pnand %p187_p10, %p184_p9 }
  0x14   : > { %192 = shalt.err (!%p189_p11)
}
  0x15   : > { %s193_s20 = scalar_lea.vmem %s74_s11, 128  ;;  %p201_p1 = scmp.lt.s32.totalorder %s74_s11, %s74_s11 }
  0x16   : > { %p194_p12 = scmp.ne.s32.totalorder %s74_s11, %s193_s20  ;;  %p202_p4 = scmp.lt.s32.totalorder %s193_s20, %s193_s20 }
  0x18   : > { %p196_p13 = pnand %p194_p12, %p182_p7  ;;  %p203_p3 = por %p202_p4, %p201_p1 }
  0x1a   : > { %p197_p0 = pneg %p196_p13 }
  0x1c   : > { %p204_p2 = pnand %p203_p3, %p197_p0 }
  0x1e   : > { %207 = shalt.err (!%p204_p2)
}
  0x1f   : > { %165 = dma.hbm_to_vmem [thread:$0]  (!%p284_p5), %s341_s0, 128, %s74_s11, [#allocation3]  }
  0x20   : > { %p349_p6 = scmp.ne.s32.totalorder %s346_s8, 0 }
  0x21   : > { %p350_p8 = scmp.ne.s32.totalorder (!%p349_p6), %s347_s9, 0 }
  0x22   : > { %86 = sbr.rel (%p349_p6) target bundleno = 67 (0x43), region = 24 }
  0x29   : > { %239 = dma.done.wait (%p350_p8), [#allocation3], 128  }
  0x2a   : > { %241 = vsyncadd (%p350_p8), [#allocation3], 4294967168  ;;  %s251_s23 = smov [#allocation5]   ;;  %v96_v0 = vld [vmem:[#allocation2] sm:$0xff]  ;;  %p312_p2 = scmp.eq.s32.totalorder %s145_s7, 1 }
  0x2b   : > { %s106_s24 = sshll.u32 %s251_s23, 4  ;;  %v97_v1 = vadd.f32 1.0, %v96_v0  ;;  %s107_s24 = int_to_ptr.vmem [resolvable:$true] %s106_s24 }
  0x2c   : > { %s208_s26 = scalar_lea.vmem %s107_s24, 128  ;;  %p215_p9 = scmp.lt.s32.totalorder %s107_s24, %s107_s24 }
  0x2d   : > { %98 = vst [vmem:[#allocation5] sm:$0xff] %v97_v1  ;;  %p209_p3 = scmp.ne.s32.totalorder %s107_s24, %s208_s26  ;;  %p216_p10 = scmp.lt.s32.totalorder %s208_s26, %s208_s26 }
  0x2f   : > { %p210_p5 = pnand %p209_p3, %p312_p2  ;;  %p217_p11 = por %p216_p10, %p215_p9 }
  0x31   : > { %p211_p7 = pneg %p210_p5 }
  0x33   : > { %p218_p12 = pnand %p217_p11, %p211_p7 }
  0x35   : > { %221 = shalt.err (!%p218_p12)
}
  0x36   : > { %s222_s29 = scalar_lea.hbm %s342_s1, 128 }
  0x37   : > { %p223_p13 = scmp.ne.s32.totalorder %s342_s1, %s222_s29  ;;  %p228_p4 = scmp.lt.u32.totalorder %s222_s29, %s342_s1 }
  0x39   : > { %p224_p0 = pnand %p223_p13, %p312_p2 }
  0x3b   : > { %p225_p1 = pneg %p224_p0 }
  0x3d   : > { %p230_p6 = pnand %p228_p4, %p225_p1 }
  0x3f   : > { %233 = shalt.err (!%p230_p6)
}
  0x40   : > { %159 = dma.vmem_to_hbm [thread:$0]  (%p312_p2), %s107_s24, 128, %s342_s1, [#allocation4]  }
  0x41   : > { %243 = dma.done.wait (%p312_p2), [#allocation4], 128  }
  0x42   : > { %245 = vsyncadd (%p312_p2), [#allocation4], 4294967168 }
  0x43 PF: > { %s13_s6 = sadd.s32 1, %s248_s6  }
  0x44   : > { %p10_p8 = scmp.ge.s32.totalorder %s13_s6, 4  }
  0x46   :  { %12 = sbr.rel (!%p10_p8) target bundleno = 2 (0x2), region = 53 }
  0x4d   :  { %119 = vsyncpa [#allocation3], 1 }
  0x4e   :  { %121 = vsyncpa [#allocation3 + $0x1], 1 }
  0x4f   :  { %122 = vsyncpa [#allocation4], 1 }
  0x50   :  { %124 = vsyncpa [#allocation4 + $0x1], 1 }

// kernel: tpu_custom_call.1
= control target key start
LH: loop header
LB: loop body
LE: loop exit
PB: predicated region body
PF: predicated region fallthrough
CT: control target
= control target key end

     0   :  { %8 = vsyncpa [#allocation3], 0  ;;  %s220_s0 = inlined_call_operand.hbm [shape: f32[16,32], index: 0, kind: input, shape index: {}]   ;;  %s221_s1 = inlined_call_operand.vmem [shape: f32[1,32], index: 1, kind: input, shape index: {}]   ;;  %s222_s2 = inlined_call_operand.vmem [shape: f32[1,32], index: 2, kind: input, shape index: {}]   ;;  %s223_s3 = inlined_call_operand.hbm [shape: f32[16,32], index: 3, kind: output, shape index: {}]  }
   0x1   :  { %9 = vsyncpa [#allocation4], 0  ;;  %s154_s12 = smov [#allocation2]   ;;  %s106_s16 = scalar_lea.hbm %s220_s0, 256 }
   0x2   :  { %s15_s13 = sshll.u32 %s154_s12, 4  ;;  %p107_p0 = scmp.ne.s32.totalorder %s220_s0, %s106_s16  ;;  %s16_s13 = int_to_ptr.vmem [resolvable:$true] %s15_s13 }
   0x3   :  { %p110_p1 = scmp.lt.u32.totalorder %s106_s16, %s220_s0 }
   0x5   :  { %p112_p2 = pnand %p110_p1, %p107_p0 }
   0x7   :  { %115 = shalt.err (!%p112_p2)
}
   0x8   :  { %s116_s21 = scalar_lea.vmem %s16_s13, 256  ;;  %p121_p4 = scmp.lt.s32.totalorder %s16_s13, %s16_s13 }
   0x9   :  { %p117_p3 = scmp.ne.s32.totalorder %s16_s13, %s116_s21  ;;  %p122_p5 = scmp.lt.s32.totalorder %s116_s21, %s116_s21 }
   0xb   :  { %p123_p6 = por %p122_p5, %p121_p4 }
   0xd   :  { %p124_p7 = pnand %p123_p6, %p117_p3 }
   0xf   :  { %127 = shalt.err (!%p124_p7)
}
  0x10   :  { %s155_s22 = smov 128   ;;  %s156_s23 = smov 8  }
  0x11   :  { %21 = dma.hbm_to_vmem [thread:$0]  %s220_s0, 256, %s16_s13, [#allocation3], %s155_s22, %s155_s22, %s156_s23  }
  0x12   :  { %150 = dma.done.wait [#allocation3], 256  }
  0x13   :  { %151 = vsyncadd [#allocation3], 4294967040  ;;  %vm31_vm0 = vcmask 261120   ;;  %v29_v0 = vld [vmem:[#allocation2] sm:$0xff]  ;;  %v30_v1 = vld [vmem:[#allocation2 + $0x8] sm:$0xff]  ;;  %s157_s29 = smov [#allocation5]  }
  0x14   :  { %v32_v2 = vsel %vm31_vm0, %v29_v0, 0.0  ;;  %v35_v3 = vsel %vm31_vm0, %v30_v1, 0.0  ;;  %v96_v21 = vld [vmem:[%s221_s1] ss:$0 sm:$0xff]  ;;  %s84_s30 = sshll.u32 %s157_s29, 4  ;;  %s85_s30 = int_to_ptr.vmem [resolvable:$true] %s84_s30 }
  0x15   :  { %33 = vadd.xlane.f32.xlu0 %v32_v2  ;;  %v97_v23 = vld [vmem:[%s222_s2] ss:$0 sm:$0xff]  ;;  %s128_s4 = scalar_lea.vmem %s85_s30, 256  ;;  %p133_p9 = scmp.lt.s32.totalorder %s85_s30, %s85_s30 }
  0x16   :  { %p129_p8 = scmp.ne.s32.totalorder %s85_s30, %s128_s4  ;;  %p134_p10 = scmp.lt.s32.totalorder %s128_s4, %s128_s4 }
  0x18   :  { %p135_p11 = por %p134_p10, %p133_p9 }
  0x19   :  { %36 = vadd.xlane.f32.xlu0 %v35_v3 }
  0x1a   :  { %p136_p12 = pnand %p135_p11, %p129_p8 }
  0xa2   :  { %v34_v4 = vpop.xlane.xlu0 %33 }
  0xa3   :  { %v39_v5 = vmul.f32 0.03125, %v34_v4 }
  0xa5   :  { %v41_v6 = vsub.f32 %v29_v0, %v39_v5 }
  0xa6   :  { %v37_v7 = vpop.xlane.xlu0 %36 }
  0xa7   :  { %v40_v8 = vmul.f32 0.03125, %v37_v7  ;;  %v43_v9 = vmul.f32 %v41_v6, %v41_v6 }
  0xa9   :  { %v42_v10 = vsub.f32 %v30_v1, %v40_v8  ;;  %v45_v11 = vsel %vm31_vm0, %v43_v9, 0.0 }
  0xaa   :  { %46 = vadd.xlane.f32.xlu1 %v45_v11 }
  0xab   :  { %v44_v12 = vmul.f32 %v42_v10, %v42_v10 }
  0xad   :  { %v48_v13 = vsel %vm31_vm0, %v44_v12, 0.0 }
  0xae   :  { %49 = vadd.xlane.f32.xlu1 %v48_v13 }
 0x137   :  { %v47_v14 = vpop.xlane.xlu1 %46 }
 0x138   :  { %v51_v15 = vmul.f32 0.03125, %v47_v14 }
 0x13a   :  { %v53_v16 = vadd.f32 1e-06, %v51_v15 }
 0x13b   :  { %v50_v17 = vpop.xlane.xlu1 %49 }
 0x13c   :  { %102 = vrsqrt.f32 %v53_v16  ;;  %v52_v18 = vmul.f32 0.03125, %v50_v17 }
 0x13e   :  { %v54_v19 = vadd.f32 1e-06, %v52_v18 }
 0x140   :  { %104 = vrsqrt.f32 %v54_v19 }
 0x146   :  { %v103_v20 = vpop.eup %102 }
 0x147   :  { %v57_v22 = vmul.f32 %v103_v20, %v41_v6 }
 0x149   :  { %v66_v24 = vmul.f32 %v96_v21, %v57_v22 }
 0x14a   :  { %v105_v25 = vpop.eup %104 }
 0x14b   :  { %v58_v26 = vmul.f32 %v105_v25, %v42_v10  ;;  %v75_v27 = vadd.f32 %v97_v23, %v66_v24 }
 0x14d   :  { %v67_v28 = vmul.f32 %v96_v21, %v58_v26  ;;  %77 = vst.msk [vmem:[#allocation5] sm:$0xff] %vm31_vm0, %v75_v27 }
 0x14f   :  { %v76_v29 = vadd.f32 %v97_v23, %v67_v28 }
 0x151   :  { %78 = vst.msk [vmem:[#allocation5 + $0x8] sm:$0xff] %vm31_vm0, %v76_v29 }
 0x152   :  { %139 = shalt.err (!%p136_p12)
}
 0x153   :  { %s140_s5 = scalar_lea.hbm %s223_s3, 256 }
 0x154   :  { %p141_p13 = scmp.ne.s32.totalorder %s223_s3, %s140_s5  ;;  %p144_p0 = scmp.lt.u32.totalorder %s140_s5, %s223_s3 }
 0x156   :  { %p146_p1 = pnand %p144_p0, %p141_p13 }
 0x158   :  { %149 = shalt.err (!%p146_p1)
}
 0x159   :  { %90 = dma.vmem_to_hbm [thread:$0]  %s85_s30, 256, %s223_s3, [#allocation4], %s155_s22, %s155_s22, %s156_s23  }
 0x15a   :  { %152 = dma.done.wait [#allocation4], 256  }
 0x15b   :  { %153 = vsyncadd [#allocation4], 4294967040 }
 0x15c   :  { %94 = vsyncpa [#allocation3], 1 }
 0x15d   :  { %95 = vsyncpa [#allocation4], 1 }

</bundles_post_ra>
